<compile_context>
chip_gen: v7x
topology: tpu7x:2x2x1
jax: 0.10.0
libtpu: 0.0.40
codegen_flags: <defaults>
</compile_context>

<pallas_src>
import functools

import jax
import jax.numpy as jnp
from jax.experimental import pallas as pl
from jax.experimental.pallas import tpu as pltpu

_LANES = 128


def _round_up(n, m):
    return ((n + m - 1) // m) * m


def _default_num_tiles():
    """2 parallel tiles on v7x (2 TensorCores/chip), 1 on single-TC chips."""
    try:
        kind = jax.devices()[0].device_kind.lower()
    except Exception:  # pragma: no cover - defensive
        return 1
    return 2 if "7" in kind else 1


_NUM_TILES_DEFAULT = _default_num_tiles()


def policy_kernel(xT_ref, w1_ref, b1_ref, w2_ref, b2_ref, meanT_ref):
    # fc1 + ReLU, feature-major: (H, S) @ (S, TB) -> (H, TB).  TB is a multiple
    # of 128 so the intermediate and both stores are lane-dense; H=64 stays
    # unpadded (VMEM-internal, MXU handles K=64 natively).
    hT = jnp.dot(w1_ref[...], xT_ref[...], preferred_element_type=jnp.float32)
    hT = jnp.maximum(hT + b1_ref[...], 0.0)
    # fc2_mean: (A, H) @ (H, TB) -> (A, TB); A is the full (tiny) array dim so
    # no padding and only A*TB*4 bytes are written back.
    mT = jnp.dot(w2_ref[...], hT, preferred_element_type=jnp.float32)
    meanT_ref[...] = mT + b2_ref[...]


def prepare_policy_params(fc1_weight, fc1_bias, fc2_weight, fc2_bias):
    """One-time conversion of torch-layout params to the kernel layout.

    fc1_weight: (hidden, state_space)   fc1_bias: (hidden,)
    fc2_weight: (action_space, hidden)  fc2_bias: (action_space,)
    Done once at init so no pad/cast HLOs run on every forward call.
    """
    f32 = jnp.float32
    w1 = jnp.asarray(fc1_weight, f32)                 # (H, S)
    b1 = jnp.asarray(fc1_bias, f32).reshape(-1, 1)    # (H, 1)
    w2 = jnp.asarray(fc2_weight, f32)                 # (A, H)
    b2 = jnp.asarray(fc2_bias, f32).reshape(-1, 1)    # (A, 1)
    return w1, b1, w2, b2


@functools.partial(jax.jit, static_argnames=("num_tiles", "max_cols_per_tile"))
def policy_forward(x, w1, b1, w2, b2, sigma, *, num_tiles=_NUM_TILES_DEFAULT,
                   max_cols_per_tile=16384):
    """Returns (action_mean, scale) of the Normal the torch module would build.

    x: (B, state_space) f32; w1/b1/w2/b2 from prepare_policy_params; sigma: (1,).
    """
    B, S = x.shape
    H = w1.shape[0]
    A = w2.shape[0]
    f32 = jnp.float32

    # One tile per TensorCore; split further only if a tile would exceed a few
    # MiB of VMEM (huge stacked rollout batches).
    tiles = max(int(num_tiles), 1)
    tiles = max(tiles, -(-_round_up(B, _LANES) // max_cols_per_tile))
    Bp = _round_up(B, _LANES * tiles)
    TB = Bp // tiles

    # Per-call input prep: transpose + lane-pad the activations only (~KBs).
    xT = jnp.pad(x.astype(f32).T, ((0, 0), (0, Bp - B)))   # (S, Bp)

    flops = 2 * Bp * (S * H + H * A)
    bytes_accessed = 4 * (S * Bp + H * S + H + A * H + A + A * Bp)

    meanT = pl.pallas_call(
        policy_kernel,
        out_shape=jax.ShapeDtypeStruct((A, Bp), f32),
        grid=(tiles,),
        in_specs=[
            pl.BlockSpec((S, TB), lambda i: (0, i)),   # xT: streamed per batch tile
            pl.BlockSpec((H, S), lambda i: (0, 0)),    # fc1 weight: resident
            pl.BlockSpec((H, 1), lambda i: (0, 0)),    # fc1 bias:   resident
            pl.BlockSpec((A, H), lambda i: (0, 0)),    # fc2 weight: resident
            pl.BlockSpec((A, 1), lambda i: (0, 0)),    # fc2 bias:   resident
        ],
        out_specs=pl.BlockSpec((A, TB), lambda i: (0, i)),
        compiler_params=pltpu.CompilerParams(
            dimension_semantics=("parallel",)),        # shards tiles across TCs on v7x
        cost_estimate=pl.CostEstimate(
            flops=flops, transcendentals=0, bytes_accessed=bytes_accessed),
    )(xT, w1, b1, w2, b2)

    action_mean = meanT[:, :B].T                       # (B, A)
    # Scalar epilogue stays in plain JAX (no VMEM-tile-sized DMA for one scalar).
    scale = jnp.sqrt(sigma)
    return action_mean, scale


def init_policy_params(key, state_space, action_space, hidden=64):
    """Mirrors Policy.init_weights: normal_(weight), zeros_(bias), sigma = 10.0.

    Weights are created in torch Linear layout (out_features, in_features).
    """
    k1, k2 = jax.random.split(key)
    fc1_w = jax.random.normal(k1, (hidden, state_space), dtype=jnp.float32)
    fc1_b = jnp.zeros((hidden,), dtype=jnp.float32)
    fc2_w = jax.random.normal(k2, (action_space, hidden), dtype=jnp.float32)
    fc2_b = jnp.zeros((action_space,), dtype=jnp.float32)
    sigma = jnp.full((1,), 10.0, dtype=jnp.float32)
    return fc1_w, fc1_b, fc2_w, fc2_b, sigma


if __name__ == "__main__":
    state_space = 8
    action_space = 2
    hidden = 64
    batch = 256          # stacked rollout batch

    key = jax.random.PRNGKey(0)
    k_params, k_x = jax.random.split(key)
    fc1_w, fc1_b, fc2_w, fc2_b, sigma = init_policy_params(
        k_params, state_space, action_space, hidden)
    x = jax.random.normal(k_x, (batch, state_space), dtype=jnp.float32)

    # Prepare (cast/reshape) parameters ONCE, outside the per-step forward.
    w1, b1, w2, b2 = prepare_policy_params(fc1_w, fc1_b, fc2_w, fc2_b)

    mean, scale = policy_forward(x, w1, b1, w2, b2, sigma)
    jax.block_until_ready((mean, scale))

    # reference check in plain JAX (torch-layout math)
    h_ref = jnp.maximum(x @ fc1_w.T + fc1_b.reshape(1, -1), 0.0)
    mean_ref = h_ref @ fc2_w.T + fc2_b.reshape(1, -1)
    scale_ref = jnp.sqrt(sigma)
    assert mean.shape == (batch, action_space)
    assert jnp.allclose(mean, mean_ref, atol=1e-4, rtol=1e-5), "mean mismatch"
    assert jnp.allclose(scale, scale_ref, atol=1e-6), "scale mismatch"

    print("KERNEL_OK")
</pallas_src>

<mosaic_0001>
module attributes {stable_mosaic.version = 11 : i64} {
  func.func @policy_kernel(%arg0: i32, %arg1: memref<8x256xf32, #tpu.memory_space<vmem>>, %arg2: memref<64x8xf32, #tpu.memory_space<vmem>>, %arg3: memref<64x1xf32, #tpu.memory_space<vmem>>, %arg4: memref<2x64xf32, #tpu.memory_space<vmem>>, %arg5: memref<2x1xf32, #tpu.memory_space<vmem>>, %arg6: memref<2x256xf32, #tpu.memory_space<vmem>>) attributes {dimension_semantics = [#tpu.dimension_semantics<parallel>], iteration_bounds = array<i64: 1>, scalar_prefetch = 0 : i64, scratch_operands = 0 : i64, tpu.core_type = #tpu.core_type<tc>, window_params = [{transform_indices = @transform_0, window_bounds = array<i64: 8, 256>}, {pipeline_mode = #tpu.pipeline_mode<synchronous>, transform_indices = @transform_1, window_bounds = array<i64: 64, 8>}, {pipeline_mode = #tpu.pipeline_mode<synchronous>, transform_indices = @transform_2, window_bounds = array<i64: 64, 1>}, {pipeline_mode = #tpu.pipeline_mode<synchronous>, transform_indices = @transform_3, window_bounds = array<i64: 2, 64>}, {pipeline_mode = #tpu.pipeline_mode<synchronous>, transform_indices = @transform_4, window_bounds = array<i64: 2, 1>}, {transform_indices = @transform_5, window_bounds = array<i64: 2, 256>}]} {
    %c0 = arith.constant 0 : index
    %c0_0 = arith.constant 0 : index
    %0 = vector.load %arg2[%c0, %c0_0] : memref<64x8xf32, #tpu.memory_space<vmem>>, vector<64x8xf32>
    %c0_1 = arith.constant 0 : index
    %c0_2 = arith.constant 0 : index
    %1 = vector.load %arg1[%c0_1, %c0_2] : memref<8x256xf32, #tpu.memory_space<vmem>>, vector<8x256xf32>
    %cst = arith.constant dense<0.000000e+00> : vector<64x256xf32>
    %2 = tpu.matmul %0, %1, %cst {dimension_numbers = #tpu.dot_dimension_numbers<[1], [0], [0], [1], [0, 0, 1, 1], [], []>} : vector<64x8xf32>, vector<8x256xf32>, vector<64x256xf32> -> vector<64x256xf32>
    %c0_3 = arith.constant 0 : index
    %c0_4 = arith.constant 0 : index
    %3 = vector.load %arg3[%c0_3, %c0_4] : memref<64x1xf32, #tpu.memory_space<vmem>>, vector<64x1xf32>
    %4 = vector.broadcast %3 : vector<64x1xf32> to vector<64x256xf32>
    %5 = arith.addf %2, %4 : vector<64x256xf32>
    %cst_5 = arith.constant 0.000000e+00 : f32
    %6 = vector.broadcast %cst_5 : f32 to vector<64x256xf32>
    %7 = arith.maximumf %5, %6 : vector<64x256xf32>
    %c0_6 = arith.constant 0 : index
    %c0_7 = arith.constant 0 : index
    %8 = vector.load %arg4[%c0_6, %c0_7] : memref<2x64xf32, #tpu.memory_space<vmem>>, vector<2x64xf32>
    %cst_8 = arith.constant dense<0.000000e+00> : vector<2x256xf32>
    %9 = tpu.matmul %8, %7, %cst_8 {dimension_numbers = #tpu.dot_dimension_numbers<[1], [0], [0], [1], [0, 0, 1, 1], [], []>} : vector<2x64xf32>, vector<64x256xf32>, vector<2x256xf32> -> vector<2x256xf32>
    %c0_9 = arith.constant 0 : index
    %c0_10 = arith.constant 0 : index
    %10 = vector.load %arg5[%c0_9, %c0_10] : memref<2x1xf32, #tpu.memory_space<vmem>>, vector<2x1xf32>
    %11 = vector.broadcast %10 : vector<2x1xf32> to vector<2x256xf32>
    %12 = arith.addf %9, %11 : vector<2x256xf32>
    %c0_11 = arith.constant 0 : index
    %c0_12 = arith.constant 0 : index
    %13 = vector.load %arg6[%c0_11, %c0_12] : memref<2x256xf32, #tpu.memory_space<vmem>>, vector<2x256xf32>
    tpu.vector_store %arg6[%c0_11, %c0_12], %12 {strides = array<i32>} : memref<2x256xf32, #tpu.memory_space<vmem>>, vector<2x256xf32>,
    return
  }
  func.func @transform_0(%arg0: i32) -> (i32, i32) {
    %c0_i32 = arith.constant 0 : i32
    %c0_i32_0 = arith.constant 0 : i32
    return %c0_i32, %arg0 : i32, i32
  }
  func.func @transform_1(%arg0: i32) -> (i32, i32) {
    %c0_i32 = arith.constant 0 : i32
    %c0_i32_0 = arith.constant 0 : i32
    %c0_i32_1 = arith.constant 0 : i32
    return %c0_i32, %c0_i32_0 : i32, i32
  }
  func.func @transform_2(%arg0: i32) -> (i32, i32) {
    %c0_i32 = arith.constant 0 : i32
    %c0_i32_0 = arith.constant 0 : i32
    %c0_i32_1 = arith.constant 0 : i32
    return %c0_i32, %c0_i32_0 : i32, i32
  }
  func.func @transform_3(%arg0: i32) -> (i32, i32) {
    %c0_i32 = arith.constant 0 : i32
    %c0_i32_0 = arith.constant 0 : i32
    %c0_i32_1 = arith.constant 0 : i32
    return %c0_i32, %c0_i32_0 : i32, i32
  }
  func.func @transform_4(%arg0: i32) -> (i32, i32) {
    %c0_i32 = arith.constant 0 : i32
    %c0_i32_0 = arith.constant 0 : i32
    %c0_i32_1 = arith.constant 0 : i32
    return %c0_i32, %c0_i32_0 : i32, i32
  }
  func.func @transform_5(%arg0: i32) -> (i32, i32) {
    %c0_i32 = arith.constant 0 : i32
    %c0_i32_0 = arith.constant 0 : i32
    return %c0_i32, %arg0 : i32, i32
  }
}

</mosaic_0001>

<bundles_post_ra>
// kernel: policy_forward.1
= control target key start
LH: loop header
LB: loop body
LE: loop exit
PB: predicated region body
PF: predicated region fallthrough
CT: control target
= control target key end

     0   :  { %vm79_vm0 = vcmask 64512   ;;  %v396_v3 = vmov 0.0   ;;  %v397_v4 = vmov 0   ;;  %s509_s0 = inlined_call_operand.vmem [shape: f32[8,256], index: 0, kind: input, shape index: {}]   ;;  %s510_s1 = inlined_call_operand.vmem [shape: f32[64,8], index: 1, kind: input, shape index: {}]   ;;  %s511_s2 = inlined_call_operand.vmem [shape: f32[64,1], index: 2, kind: input, shape index: {}]   ;;  %s512_s3 = inlined_call_operand.vmem [shape: f32[2,64], index: 3, kind: input, shape index: {}]   ;;  %s513_s4 = inlined_call_operand.vmem [shape: f32[2,1], index: 4, kind: input, shape index: {}]   ;;  %s514_s5 = inlined_call_operand.hbm [shape: f32[2,256], index: 5, kind: output, shape index: {}]  }
   0x1   :  { %v30_v0 = vld [vmem:[%s509_s0 + $0x8] sm:$0xff]  ;;  %v29_v1 = vld [vmem:[%s509_s0] sm:$0xff]  ;;  %168 = vmatprep.mubr.f32.mxu0 %v396_v3  ;;  %370 = vset.pattern.permute.xlu0 %v397_v4  ;;  %v33_v7 = vld [vmem:[%s511_s2 + $0x10] sm:$0xff] }
   0x2   :  { %v21_v2 = vld [vmem:[%s510_s1] sm:$0xff]  ;;  %104 = vmatprep.subr.mxu0 %v30_v0  ;;  %371 = vset.pattern.permute.xlu1 %v397_v4  ;;  %v22_v6 = vld [vmem:[%s510_s1 + $0x8] sm:$0xff]  ;;  %v34_v9 = vld [vmem:[%s511_s2 + $0x18] sm:$0xff] }
   0x3   :  { %105 = vmatpush1.msra.mxu0 %v29_v1  ;;  %v31_v5 = vld [vmem:[%s511_s2] sm:$0xff]  ;;  %v32_v8 = vld [vmem:[%s511_s2 + $0x8] sm:$0xff]  ;;  %51 = vperm.xlu1 %371, %v33_v7  }
   0x4   :  { %341 = vmatmul.mubr.msk.f32.vlgmr.msra.gmra.mrb[0].mxu0 %vm79_vm0, %v21_v2  ;;  %41 = vperm.xlu0 %370, %v31_v5  }
   0x5   :  { %174 = vmatprep.mubr.f32.mxu0 %v396_v3  ;;  %308 = vmatprep.mubr.f32.mxu1 %v396_v3 }
   0x6   :  { %10 = vsyncpa [#allocation3], 0  ;;  %v23_v10 = vld [vmem:[%s510_s1 + $0x10] sm:$0xff]  ;;  %v35_v11 = vld [vmem:[%s511_s2 + $0x20] sm:$0xff]  ;;  %vm240_vm1 = vcmask 523264   ;;  %s398_s28 = smov [#allocation2]  }
   0x7   :  { %56 = vperm.xlu1 %371, %v34_v9   ;;  %v36_v12 = vld [vmem:[%s511_s2 + $0x28] sm:$0xff]  ;;  %v24_v13 = vld [vmem:[%s510_s1 + $0x18] sm:$0xff]  ;;  %v37_v14 = vld [vmem:[%s511_s2 + $0x30] sm:$0xff]  ;;  %s333_s29 = sshll.u32 %s398_s28, 4  ;;  %s334_s29 = int_to_ptr.vmem [resolvable:$true] %s333_s29 }
   0x8   :  { %342 = vmatmul.mubr.msk.f32.gmra.mrb[2].mxu0 %vm79_vm0, %v22_v6  ;;  %46 = vperm.xlu0 %370, %v32_v8   ;;  %v38_v15 = vld [vmem:[%s511_s2 + $0x38] sm:$0xff]  ;;  %v25_v16 = vld [vmem:[%s510_s1 + $0x20] sm:$0xff]  ;;  %v26_v18 = vld [vmem:[%s510_s1 + $0x28] sm:$0xff]  ;;  %s372_s30 = scalar_lea.vmem %s334_s29, 64  ;;  %p377_p1 = scmp.lt.s32.totalorder %s334_s29, %s334_s29 }
   0x9   :  { %180 = vmatprep.mubr.f32.mxu0 %v396_v3  ;;  %v234_v17 = vld [vmem:[%s513_s4] sm:$0x3]  ;;  %v27_v19 = vld [vmem:[%s510_s1 + $0x30] sm:$0xff]  ;;  %v28_v20 = vld [vmem:[%s510_s1 + $0x38] sm:$0xff]  ;;  %p373_p0 = scmp.ne.s32.totalorder %s334_s29, %s372_s30  ;;  %p378_p2 = scmp.lt.s32.totalorder %s372_s30, %s372_s30 }
   0xb   :  { %66 = vperm.xlu1 %371, %v36_v12   ;;  %p379_p3 = por %p378_p2, %p377_p1 }
   0xc   :  { %343 = vmatmul.mubr.msk.f32.gmra.mrb[4].mxu0 %vm79_vm0, %v23_v10  ;;  %61 = vperm.xlu0 %370, %v35_v11  }
   0xd   :  { %186 = vmatprep.mubr.f32.mxu0 %v396_v3  ;;  %p380_p4 = pnand %p379_p3, %p373_p0 }
   0xf   :  { %76 = vperm.xlu1 %371, %v38_v15  }
  0x10   :  { %344 = vmatmul.mubr.msk.f32.gmra.mrb[6].mxu0 %vm79_vm0, %v24_v13  ;;  %71 = vperm.xlu0 %370, %v37_v14  }
  0x11   :  { %192 = vmatprep.mubr.f32.mxu0 %v396_v3 }
  0x14   :  { %345 = vmatmul.mubr.msk.f32.gmra.mrb[8].mxu0 %vm79_vm0, %v25_v16  ;;  %237 = vperm.xlu0 %370, %v234_v17  }
  0x15   :  { %198 = vmatprep.mubr.f32.mxu0 %v396_v3 }
  0x18   :  { %346 = vmatmul.mubr.msk.f32.gmra.mrb[10].mxu0 %vm79_vm0, %v26_v18 }
  0x19   :  { %204 = vmatprep.mubr.f32.mxu0 %v396_v3 }
  0x1c   :  { %347 = vmatmul.mubr.msk.f32.gmra.mrb[12].mxu0 %vm79_vm0, %v27_v19 }
  0x1d   :  { %210 = vmatprep.mubr.f32.mxu0 %v396_v3 }
  0x20   :  { %348 = vmatmul.mubr.msk.f32.gmra.mrb[14].mxu0 %vm79_vm0, %v28_v20 }
  0x82   :  { %v52_v30 = vpop.permute.xlu1 %51 }
  0x83   :  { %v42_v21 = vpop.permute.xlu0 %41 }
  0x86   :  { %v57_v41 = vpop.permute.xlu1 %56 }
  0x87   :  { %v47_v25 = vpop.permute.xlu0 %46 }
  0x8a   :  { %v67_v57 = vpop.permute.xlu1 %66 }
  0x8b   :  { %v62_v54 = vpop.permute.xlu0 %61 }
  0x8e   :  { %v77_v9 = vpop.permute.xlu1 %76 }
  0x8f   :  { %v72_v6 = vpop.permute.xlu0 %71 }
  0xd7   :  { %v170_v22 = vpop.f32.mrb[0].mxu0 }
  0xd8   :  { %v172_v23 = vpop.f32.mrb[1].mxu0  ;;  %v171_v24 = vadd.f32 %v170_v22, %v42_v21  ;;  %v238_v22 = vpop.permute.xlu0 %237 }
  0xd9   :  { %v173_v26 = vadd.f32 %v172_v23, %v42_v21  ;;  %v233_v21 = vld [vmem:[%s512_s3] sm:$0x3] }
  0xda   :  { %v217_v32 = vmax.f32 %v171_v24, 0.0 }
  0xdb   :  { %v176_v27 = vpop.f32.mrb[2].mxu0  ;;  %v218_v34 = vmax.f32 %v173_v26, 0.0 }
  0xdc   :  { %v177_v28 = vadd.f32 %v176_v27, %v47_v25  ;;  %v178_v29 = vpop.f32.mrb[3].mxu0 }
  0xdd   :  { %v179_v31 = vadd.f32 %v178_v29, %v47_v25 }
  0xde   :  { %v219_v33 = vmax.f32 %v177_v28, 0.0 }
  0xdf   :  { %v220_v35 = vmax.f32 %v179_v31, 0.0  ;;  %v182_v36 = vpop.f32.mrb[4].mxu0 }
  0xe0   :  { %v184_v37 = vpop.f32.mrb[5].mxu0  ;;  %v353_v38 = vpack.c.bf16 %v219_v33, %v217_v32  ;;  %v183_v40 = vadd.f32 %v182_v36, %v52_v30 }
  0xe1   :  { %v351_v39 = vpack.c.bf16 %v220_v35, %v218_v34  ;;  %v185_v42 = vadd.f32 %v184_v37, %v52_v30 }
  0xe2   :  { %v221_v47 = vmax.f32 %v183_v40, 0.0 }
  0xe3   :  { %v188_v43 = vpop.f32.mrb[6].mxu0  ;;  %352 = vmatprep.subr.bf16.mxu1 %v351_v39  ;;  %v222_v49 = vmax.f32 %v185_v42, 0.0 }
  0xe4   :  { %v189_v44 = vadd.f32 %v188_v43, %v57_v41  ;;  %v190_v45 = vpop.f32.mrb[7].mxu0  ;;  %354 = vmatpush1.bf16.msra.mxu1 %v353_v38 }
  0xe5   :  { %v191_v46 = vadd.f32 %v190_v45, %v57_v41 }
  0xe6   :  { %v223_v48 = vmax.f32 %v189_v44, 0.0 }
  0xe7   :  { %v224_v50 = vmax.f32 %v191_v46, 0.0  ;;  %v194_v51 = vpop.f32.mrb[8].mxu0 }
  0xe8   :  { %v357_v52 = vpack.c.bf16 %v223_v48, %v221_v47  ;;  %v196_v53 = vpop.f32.mrb[9].mxu0  ;;  %v195_v56 = vadd.f32 %v194_v51, %v62_v54 }
  0xe9   :  { %v355_v55 = vpack.c.bf16 %v224_v50, %v222_v49  ;;  %v197_v58 = vadd.f32 %v196_v53, %v62_v54 }
  0xea   :  { %v225_v63 = vmax.f32 %v195_v56, 0.0 }
  0xeb   :  { %v200_v59 = vpop.f32.mrb[10].mxu0  ;;  %356 = vmatprep.subr.bf16.mxu1 %v355_v55  ;;  %v226_v1 = vmax.f32 %v197_v58, 0.0 }
  0xec   :  { %v201_v60 = vadd.f32 %v200_v59, %v67_v57  ;;  %v202_v61 = vpop.f32.mrb[11].mxu0  ;;  %358 = vmatpush1.bf16.msra.mxu1 %v357_v52 }
  0xed   :  { %v203_v62 = vadd.f32 %v202_v61, %v67_v57 }
  0xee   :  { %v227_v0 = vmax.f32 %v201_v60, 0.0 }
  0xef   :  { %v228_v2 = vmax.f32 %v203_v62, 0.0  ;;  %v206_v3 = vpop.f32.mrb[12].mxu0 }
  0xf0   :  { %v361_v4 = vpack.c.bf16 %v227_v0, %v225_v63  ;;  %v208_v5 = vpop.f32.mrb[13].mxu0  ;;  %v207_v8 = vadd.f32 %v206_v3, %v72_v6 }
  0xf1   :  { %v359_v7 = vpack.c.bf16 %v228_v2, %v226_v1  ;;  %v209_v10 = vadd.f32 %v208_v5, %v72_v6 }
  0xf2   :  { %v229_v15 = vmax.f32 %v207_v8, 0.0 }
  0xf3   :  { %v212_v11 = vpop.f32.mrb[14].mxu0  ;;  %360 = vmatprep.subr.bf16.mxu1 %v359_v7  ;;  %v230_v17 = vmax.f32 %v209_v10, 0.0 }
  0xf4   :  { %v213_v12 = vadd.f32 %v212_v11, %v77_v9  ;;  %v214_v13 = vpop.f32.mrb[15].mxu0  ;;  %362 = vmatpush1.bf16.msra.mxu1 %v361_v4 }
  0xf5   :  { %v215_v14 = vadd.f32 %v214_v13, %v77_v9 }
  0xf6   :  { %v231_v16 = vmax.f32 %v213_v12, 0.0 }
  0xf7   :  { %v232_v18 = vmax.f32 %v215_v14, 0.0 }
  0xf8   :  { %v365_v19 = vpack.c.bf16 %v231_v16, %v229_v15 }
  0xf9   :  { %v363_v20 = vpack.c.bf16 %v232_v18, %v230_v17 }
  0xfb   :  { %364 = vmatprep.subr.bf16.mxu1 %v363_v20 }
  0xfc   :  { %366 = vmatpush1.bf16.msra.mxu1 %v365_v19 }
  0xff   :  { %349 = vmatmul.mubr.msk.f32.vlgmr.msra.gmra.mrb[0].mxu1 %vm240_vm1, %v233_v21 }
 0x1d2   :  { %v310_v23 = vpop.f32.mrb[0].mxu1 }
 0x1d3   :  { %v311_v24 = vadd.f32 %v310_v23, %v238_v22  ;;  %v312_v25 = vpop.f32.mrb[1].mxu1 }
 0x1d4   :  { %v313_v26 = vadd.f32 %v312_v25, %v238_v22 }
 0x1d6   :  { %v317_v27 = vcombine.low %v311_v24, %v313_v26 }
 0x1d8   :  { %350 = vst.sshfl [vmem:[#allocation2] sm:$0x33 pattern:$0x76325410] %v317_v27 }
 0x1d9   :  { %383 = shalt.err (!%p380_p4)
}
 0x1da   :  { %s384_s7 = scalar_lea.hbm %s514_s5, 64 }
 0x1db   :  { %p385_p5 = scmp.ne.s32.totalorder %s514_s5, %s384_s7  ;;  %p388_p6 = scmp.lt.u32.totalorder %s384_s7, %s514_s5 }
 0x1dd   :  { %p390_p7 = pnand %p388_p6, %p385_p5 }
 0x1df   :  { %393 = shalt.err (!%p390_p7)
}
 0x1e0   :  { %336 = dma.vmem_to_hbm [thread:$0]  %s334_s29, 64, %s514_s5, [#allocation3]  }
 0x1e1   :  { %394 = dma.done.wait [#allocation3], 64  }
 0x1e2   :  { %395 = vsyncadd [#allocation3], 4294967232 }
 0x1e3   :  { %340 = vsyncpa [#allocation3], 1 }

</bundles_post_ra>
